<compile_context>
chip_gen: v7x
topology: tpu7x:2x2x1
jax: 0.10.0
libtpu: 0.0.40
codegen_flags: <defaults>
</compile_context>

<pallas_src>
import functools

import jax
import jax.numpy as jnp
from jax.experimental import pallas as pl
from jax.experimental.pallas import tpu as pltpu

PATCH = 8                    # latent downsample factor (512 // 8 in the config)
PATCH2 = PATCH * PATCH
LATENT_CH = 4                # unet.in_channels for Stable Diffusion
VAE_SCALING = 0.18215


# --------------------------------------------------------------------------- #
# Small helpers
# --------------------------------------------------------------------------- #
def _round_up(x, m):
    return ((x + m - 1) // m) * m


def _pad_last(x, target):
    pad = target - x.shape[-1]
    if pad == 0:
        return x
    cfg = [(0, 0)] * (x.ndim - 1) + [(0, pad)]
    return jnp.pad(x, cfg)


def _pick_m_tile(m_padded, want_large=False):
    """Lane-aligned M tile; prefers >= 2 grid steps (megacore / pipelining)."""
    cap = 4096
    if want_large:
        try:
            if pltpu.get_tpu_info().vmem_capacity_bytes >= 100 * 1024 * 1024:
                cap = 8192                      # big-VMEM generations only
        except Exception:
            pass
    t = cap
    while t > 128:
        if m_padded % t == 0 and m_padded // t >= 2:
            return t
        t //= 2
    return min(128, m_padded)


# --------------------------------------------------------------------------- #
# Pallas kernels
# --------------------------------------------------------------------------- #
def _encode_single_kernel(x_ref, w_ref, o_ref):
    # x_ref: (K, tm) patchified tile (K on sublanes, patches on lanes)
    # w_ref: (N, K)  projection weights (VAE scaling pre-folded)
    # o_ref: (N, tm) lane-dense output tile
    o_ref[...] = jnp.dot(w_ref[...], x_ref[...],
                         preferred_element_type=jnp.float32).astype(o_ref.dtype)


def _encode_dual_fast_kernel(x_ref, m_ref, w_ref, o_ref):
    # Fast path: mask constant within each 8x8 patch -> column scaling commutes
    # through the matmul, so one matmul serves both branches.
    # x_ref: (K, tm), m_ref: (1, tm), w_ref: (N, K), o_ref: (2N, tm)
    acc = jnp.dot(w_ref[...], x_ref[...], preferred_element_type=jnp.float32)
    m = m_ref[...].astype(jnp.float32)                      # (1, tm)
    o_ref[...] = jnp.concatenate([acc, acc * m], axis=0).astype(o_ref.dtype)


def _encode_dual_kernel(x_ref, m_ref, w_ref, o_ref, *, n_ch):
    # General path: per-pixel patch mask, plain + masked projection fused in
    # one HBM pass over the image patches.
    # x_ref: (K, tm), m_ref: (PATCH2, tm), w_ref: (N, K), o_ref: (2N, tm)
    x = x_ref[...]
    w = w_ref[...]
    m_full = jnp.tile(m_ref[...], (n_ch, 1))                # (K, tm)
    acc_i = jnp.dot(w, x, preferred_element_type=jnp.float32)
    acc_m = jnp.dot(w, x * m_full, preferred_element_type=jnp.float32)
    o_ref[...] = jnp.concatenate([acc_i, acc_m], axis=0).astype(o_ref.dtype)


# --------------------------------------------------------------------------- #
# Layout plumbing (wrapper-side; latent-sized arrays are tiny)
# --------------------------------------------------------------------------- #
def _patchify(images):
    """NCHW -> (C*PATCH*PATCH, B*Hl*Wl) transposed patch layout.

    TODO(synk): fold this transpose into the kernel (read NCHW directly); the
    stride-8 lane de-interleave has no robust Mosaic lowering path today.
    """
    B, C, H, W = images.shape
    Hl, Wl = H // PATCH, W // PATCH
    x = images.reshape(B, C, Hl, PATCH, Wl, PATCH)
    x = x.transpose(1, 3, 5, 0, 2, 4)            # (C, dy, dx, B, Hl, Wl)
    return x.reshape(C * PATCH2, B * Hl * Wl)


def _mask_is_patch_constant(mask_shape, H, W):
    _, Hm, Wm = mask_shape
    return (H % Hm == 0 and W % Wm == 0
            and (H // Hm) % PATCH == 0 and (W // Wm) % PATCH == 0)


def _patch_mask(ref_masks, H, W):
    """Fast path: per-patch mask value -> (1, B*Hl*Wl)."""
    B, Hm, Wm = ref_masks.shape
    Hl, Wl = H // PATCH, W // PATCH
    qh, qw = H // (Hm * PATCH), W // (Wm * PATCH)
    m = ref_masks[:, jnp.arange(Hl) // qh, :][:, :, jnp.arange(Wl) // qw]
    return m.reshape(1, B * Hl * Wl)


def _pixel_patch_mask(ref_masks, H, W):
    """General path: per-pixel nearest-neighbour mask in compact patch layout
    (PATCH*PATCH, B*Hl*Wl), built directly from the low-res mask."""
    B, Hm, Wm = ref_masks.shape
    Hl, Wl = H // PATCH, W // PATCH
    ih = ((jnp.arange(Hl)[:, None] * PATCH + jnp.arange(PATCH)[None, :]) * Hm) // H
    iw = ((jnp.arange(Wl)[:, None] * PATCH + jnp.arange(PATCH)[None, :]) * Wm) // W
    m = ref_masks[:, ih, :]                      # (B, Hl, 8, Wm)
    m = m[:, :, :, iw]                           # (B, Hl, 8, Wl, 8)
    m = m.transpose(2, 4, 0, 1, 3)               # (dy, dx, B, Hl, Wl)
    return m.reshape(PATCH2, B * Hl * Wl)


def _latents_from_nm(out_nm, B, Hl, Wl):
    """(N, B*Hl*Wl) -> NCHW latents (tiny array; negligible transpose)."""
    return out_nm.reshape(LATENT_CH, B, Hl, Wl).transpose(1, 0, 2, 3)


# --------------------------------------------------------------------------- #
# Encode entry points
# --------------------------------------------------------------------------- #
def vae_encode_proxy(images, w_kernel):
    """`vae.encode(images).latent_dist.sample() * 0.18215` synthetic proxy."""
    B, C, H, W = images.shape
    Hl, Wl = H // PATCH, W // PATCH
    M = B * Hl * Wl
    M_pad = _round_up(M, 128)
    N, K = LATENT_CH, C * PATCH2

    x_k = _pad_last(_patchify(images), M_pad)
    w_k = w_kernel.astype(images.dtype)
    tm = _pick_m_tile(M_pad, want_large=True)

    itemsize = jnp.dtype(images.dtype).itemsize
    cost = pl.CostEstimate(
        flops=2 * M_pad * K * N, transcendentals=0,
        bytes_accessed=(K * M_pad + N * K + N * M_pad) * itemsize)

    out = pl.pallas_call(
        _encode_single_kernel,
        out_shape=jax.ShapeDtypeStruct((N, M_pad), images.dtype),
        grid=(M_pad // tm,),
        in_specs=[
            pl.BlockSpec((K, tm), lambda i: (0, i)),
            pl.BlockSpec((N, K), lambda i: (0, 0)),
        ],
        out_specs=pl.BlockSpec((N, tm), lambda i: (0, i)),
        compiler_params=pltpu.CompilerParams(dimension_semantics=("parallel",)),
        cost_estimate=cost,
    )(x_k, w_k)
    return _latents_from_nm(out[:, :M], B, Hl, Wl)


def vae_encode_dual_proxy(images, ref_masks, w_kernel):
    """Fused: encode(images) and encode(images * mask) in a single HBM pass."""
    B, C, H, W = images.shape
    Hl, Wl = H // PATCH, W // PATCH
    M = B * Hl * Wl
    M_pad = _round_up(M, 128)
    N, K = LATENT_CH, C * PATCH2

    x_k = _pad_last(_patchify(images), M_pad)
    w_k = w_kernel.astype(images.dtype)

    fast = _mask_is_patch_constant(ref_masks.shape, H, W)
    if fast:
        m = _patch_mask(ref_masks, H, W).astype(images.dtype)        # (1, M)
        kernel = _encode_dual_fast_kernel
        mask_rows = 1
        flops = 2 * M_pad * K * N
    else:
        m = _pixel_patch_mask(ref_masks, H, W).astype(images.dtype)  # (P2, M)
        kernel = functools.partial(_encode_dual_kernel, n_ch=C)
        mask_rows = PATCH2
        flops = 4 * M_pad * K * N
    m = _pad_last(m, M_pad)

    tm = _pick_m_tile(M_pad, want_large=fast)
    itemsize = jnp.dtype(images.dtype).itemsize
    cost = pl.CostEstimate(
        flops=flops, transcendentals=0,
        bytes_accessed=(K * M_pad + mask_rows * M_pad + N * K
                        + 2 * N * M_pad) * itemsize)

    out = pl.pallas_call(
        kernel,
        out_shape=jax.ShapeDtypeStruct((2 * N, M_pad), images.dtype),
        grid=(M_pad // tm,),
        in_specs=[
            pl.BlockSpec((K, tm), lambda i: (0, i)),
            pl.BlockSpec((mask_rows, tm), lambda i: (0, i)),
            pl.BlockSpec((N, K), lambda i: (0, 0)),
        ],
        out_specs=pl.BlockSpec((2 * N, tm), lambda i: (0, i)),
        compiler_params=pltpu.CompilerParams(dimension_semantics=("parallel",)),
        cost_estimate=cost,
    )(x_k, m, w_k)

    out = out[:, :M]
    return (_latents_from_nm(out[:LATENT_CH], B, Hl, Wl),
            _latents_from_nm(out[LATENT_CH:], B, Hl, Wl))


# --------------------------------------------------------------------------- #
# Module wrapper
# --------------------------------------------------------------------------- #
class DiffusionExtractor:
    """JAX/Pallas re-implementation of the DiffusionExtractor forward pass."""

    def __init__(self, config, seed=0):
        self.batch_size = 2
        self.diffusion_mode = config.get("diffusion_mode", "inversion")
        self.input_resolution = config["input_resolution"]          # (H, W)
        self.output_resolution = (self.input_resolution[0] // PATCH,
                                  self.input_resolution[1] // PATCH)
        self.in_channels = config.get("in_channels", 3)
        self.key = jax.random.PRNGKey(config.get("seed", seed))

        # Deterministic synthetic parameters for the VAE-encode proxy.
        k_w, self.key = jax.random.split(self.key)
        K = self.in_channels * PATCH2
        self.w_proj = jax.random.normal(k_w, (K, LATENT_CH), jnp.float32) * 0.02
        # Kernel weights: (N, K), with the VAE scaling folded in once here.
        self.w_kernel = (self.w_proj * VAE_SCALING).T

        # TODO(synk): UNet / VAE / CLIP / scheduler setup has no Pallas equivalent.

    # F.interpolate(mask[:, None], size=(H, W), mode='nearest')  (used only by
    # the pure-JAX reference check; the kernels never materialize this array)
    @staticmethod
    def _nearest_upsample(mask, H, W):
        B, Hm, Wm = mask.shape
        idx_h = (jnp.arange(H) * Hm) // H
        idx_w = (jnp.arange(W) * Wm) // W
        up = mask[:, idx_h, :][:, :, idx_w]          # (B, H, W)
        return up[:, None, :, :]                     # (B, 1, H, W)

    def forward(self, images=None, latents=None, ref_masks=None, ref_labels=None):
        if images is None:
            if latents is None:
                k, self.key = jax.random.split(self.key)
                Hl, Wl = self.output_resolution
                latents = jax.random.normal(
                    k, (self.batch_size, LATENT_CH, Hl, Wl), jnp.float32)
            # TODO(synk): generation diffusion steps (generalized_steps) not reproduced.
            return {"latents": latents}

        if ref_labels is not None and ref_masks is not None:
            mask = ref_masks.astype(images.dtype)
            # One fused Pallas call: plain + masked projection, packed output,
            # no mask_images / upsampled mask round trips through HBM.
            latents_image, latents_mask_images = vae_encode_dual_proxy(
                images, mask, self.w_kernel)
            latents = [latents_image, latents_mask_images]
        else:
            latents = vae_encode_proxy(images, self.w_kernel)

        # TODO(synk): run_inversion / get_feats_stride (UNet hooks) not reproduced.
        return {"latents": latents}

    __call__ = forward


# --------------------------------------------------------------------------- #
# Demo / smoke test
# --------------------------------------------------------------------------- #
if __name__ == "__main__":
    key = jax.random.PRNGKey(0)
    B, C, H, W = 2, 3, 32, 32          # small NCHW images (512x512 in production)
    k_img, k_m1, k_m2 = jax.random.split(key, 3)
    images = jax.random.normal(k_img, (B, C, H, W), jnp.float32)
    # General-path mask: 8x8 mask cells -> 8x8 image patches straddle cells.
    ref_masks_gen = (jax.random.uniform(k_m1, (B, 8, 8)) > 0.5).astype(jnp.float32)
    # Fast-path mask: 4x4 mask cells -> mask constant within each 8x8 patch.
    ref_masks_fast = (jax.random.uniform(k_m2, (B, 4, 4)) > 0.5).astype(jnp.float32)
    ref_labels = [jnp.array([1]), jnp.array([2])]   # truthy, as in the reference

    config = {
        "diffusion_mode": "inversion",
        "input_resolution": (H, W),
        "in_channels": C,
        "seed": 0,
    }
    extractor = DiffusionExtractor(config)
    Hl, Wl = H // PATCH, W // PATCH

    # pure-JAX reference for the Pallas kernels
    def ref_encode(imgs, w2d):
        b, c, h, w = imgs.shape
        hl, wl = h // PATCH, w // PATCH
        x = imgs.reshape(b, c, hl, PATCH, wl, PATCH)
        x = x.transpose(0, 2, 4, 1, 3, 5).reshape(b * hl * wl, c * PATCH2)
        y = (x @ w2d) * VAE_SCALING
        return y.reshape(b, hl, wl, LATENT_CH).transpose(0, 3, 1, 2)

    ref_lat_img = ref_encode(images, extractor.w_proj)

    # --- general mask path -------------------------------------------------
    out = extractor(images=images, ref_masks=ref_masks_gen, ref_labels=ref_labels)
    lat_img, lat_msk = out["latents"]
    jax.block_until_ready(lat_img)
    jax.block_until_ready(lat_msk)
    assert lat_img.shape == (B, LATENT_CH, Hl, Wl)
    assert lat_msk.shape == (B, LATENT_CH, Hl, Wl)
    mask_up = DiffusionExtractor._nearest_upsample(ref_masks_gen, H, W)
    assert jnp.allclose(lat_img, ref_lat_img, atol=1e-5, rtol=1e-5)
    assert jnp.allclose(lat_msk, ref_encode(images * mask_up, extractor.w_proj),
                        atol=1e-5, rtol=1e-5)

    # --- fast (patch-constant) mask path ------------------------------------
    out_f = extractor(images=images, ref_masks=ref_masks_fast, ref_labels=ref_labels)
    lat_img_f, lat_msk_f = out_f["latents"]
    jax.block_until_ready(lat_msk_f)
    mask_up_f = DiffusionExtractor._nearest_upsample(ref_masks_fast, H, W)
    assert jnp.allclose(lat_img_f, ref_lat_img, atol=1e-5, rtol=1e-5)
    assert jnp.allclose(lat_msk_f, ref_encode(images * mask_up_f, extractor.w_proj),
                        atol=1e-5, rtol=1e-5)

    # --- single-encode branch (no masks/labels) ------------------------------
    out_single = extractor(images=images)
    jax.block_until_ready(out_single["latents"])
    assert jnp.allclose(out_single["latents"], ref_lat_img, atol=1e-5, rtol=1e-5)

    # --- pure-generation branch (images is None): latent sampling path -------
    gen = extractor(images=None)
    jax.block_until_ready(gen["latents"])
    assert gen["latents"].shape == (2, LATENT_CH, *extractor.output_resolution)

    print("KERNEL_OK")
</pallas_src>

<mosaic_0001>
module attributes {stable_mosaic.version = 11 : i64} {
  func.func @_encode_dual_kernel(%arg0: i32, %arg1: memref<192x128xf32, #tpu.memory_space<vmem>>, %arg2: memref<64x128xf32, #tpu.memory_space<vmem>>, %arg3: memref<4x192xf32, #tpu.memory_space<vmem>>, %arg4: memref<8x128xf32, #tpu.memory_space<vmem>>) attributes {dimension_semantics = [#tpu.dimension_semantics<parallel>], iteration_bounds = array<i64: 1>, scalar_prefetch = 0 : i64, scratch_operands = 0 : i64, tpu.core_type = #tpu.core_type<tc>, window_params = [{transform_indices = @transform_0, window_bounds = array<i64: 192, 128>}, {transform_indices = @transform_1, window_bounds = array<i64: 64, 128>}, {pipeline_mode = #tpu.pipeline_mode<synchronous>, transform_indices = @transform_2, window_bounds = array<i64: 4, 192>}, {transform_indices = @transform_3, window_bounds = array<i64: 8, 128>}]} {
    %c0 = arith.constant 0 : index
    %c0_0 = arith.constant 0 : index
    %0 = vector.load %arg1[%c0, %c0_0] : memref<192x128xf32, #tpu.memory_space<vmem>>, vector<192x128xf32>
    %c0_1 = arith.constant 0 : index
    %c0_2 = arith.constant 0 : index
    %1 = vector.load %arg3[%c0_1, %c0_2] : memref<4x192xf32, #tpu.memory_space<vmem>>, vector<4x192xf32>
    %c0_3 = arith.constant 0 : index
    %c0_4 = arith.constant 0 : index
    %2 = vector.load %arg2[%c0_3, %c0_4] : memref<64x128xf32, #tpu.memory_space<vmem>>, vector<64x128xf32>
    %3 = tpu.concatenate %2, %2, %2 in 0 : vector<64x128xf32>, vector<64x128xf32>, vector<64x128xf32> -> vector<192x128xf32>
    %cst = arith.constant dense<0.000000e+00> : vector<4x128xf32>
    %4 = tpu.matmul %1, %0, %cst {dimension_numbers = #tpu.dot_dimension_numbers<[1], [0], [0], [1], [0, 0, 1, 1], [], []>} : vector<4x192xf32>, vector<192x128xf32>, vector<4x128xf32> -> vector<4x128xf32>
    %5 = arith.mulf %0, %3 : vector<192x128xf32>
    %cst_5 = arith.constant dense<0.000000e+00> : vector<4x128xf32>
    %6 = tpu.matmul %1, %5, %cst_5 {dimension_numbers = #tpu.dot_dimension_numbers<[1], [0], [0], [1], [0, 0, 1, 1], [], []>} : vector<4x192xf32>, vector<192x128xf32>, vector<4x128xf32> -> vector<4x128xf32>
    %7 = tpu.concatenate %4, %6 in 0 : vector<4x128xf32>, vector<4x128xf32> -> vector<8x128xf32>
    %c0_6 = arith.constant 0 : index
    %c0_7 = arith.constant 0 : index
    %8 = vector.load %arg4[%c0_6, %c0_7] : memref<8x128xf32, #tpu.memory_space<vmem>>, vector<8x128xf32>
    tpu.vector_store %arg4[%c0_6, %c0_7], %7 {strides = array<i32>} : memref<8x128xf32, #tpu.memory_space<vmem>>, vector<8x128xf32>,
    return
  }
  func.func @transform_0(%arg0: i32) -> (i32, i32) {
    %c0_i32 = arith.constant 0 : i32
    %c0_i32_0 = arith.constant 0 : i32
    return %c0_i32, %arg0 : i32, i32
  }
  func.func @transform_1(%arg0: i32) -> (i32, i32) {
    %c0_i32 = arith.constant 0 : i32
    %c0_i32_0 = arith.constant 0 : i32
    return %c0_i32, %arg0 : i32, i32
  }
  func.func @transform_2(%arg0: i32) -> (i32, i32) {
    %c0_i32 = arith.constant 0 : i32
    %c0_i32_0 = arith.constant 0 : i32
    %c0_i32_1 = arith.constant 0 : i32
    return %c0_i32, %c0_i32_0 : i32, i32
  }
  func.func @transform_3(%arg0: i32) -> (i32, i32) {
    %c0_i32 = arith.constant 0 : i32
    %c0_i32_0 = arith.constant 0 : i32
    return %c0_i32, %arg0 : i32, i32
  }
}

</mosaic_0001>

<bundles_post_ra>
// kernel: tpu_custom_call.1
= control target key start
LH: loop header
LB: loop body
LE: loop exit
PB: predicated region body
PF: predicated region fallthrough
CT: control target
= control target key end

     0   :  { %8 = vsyncpa [#allocation3], 0  ;;  %s606_s0 = inlined_call_operand.hbm [shape: f32[192,128], index: 0, kind: input, shape index: {}]   ;;  %s607_s1 = inlined_call_operand.hbm [shape: f32[64,128], index: 1, kind: input, shape index: {}]   ;;  %s608_s2 = inlined_call_operand.hbm [shape: f32[4,192], index: 2, kind: input, shape index: {}]   ;;  %s609_s3 = inlined_call_operand.hbm [shape: f32[8,128], index: 3, kind: output, shape index: {}]  }
   0x1   :  { %9 = vsyncpa [#allocation6], 0 }
   0x2   :  { %10 = vsyncpa [#allocation4], 0  ;;  %s454_s12 = smov [#allocation5]   ;;  %s455_s14 = smov [#allocation2]  }
   0x3   :  { %s28_s13 = sshll.u32 %s454_s12, 4  ;;  %s16_s15 = sshll.u32 %s455_s14, 4  ;;  %s29_s13 = int_to_ptr.vmem [resolvable:$true] %s28_s13  ;;  %s481_s15 = int_to_ptr.vmem [resolvable:$true] %s16_s15 }
   0x4   :  { %s360_s18 = scalar_lea.hbm %s607_s1, 1024 }
   0x5   :  { %p361_p0 = scmp.ne.s32.totalorder %s607_s1, %s360_s18  ;;  %p364_p1 = scmp.lt.u32.totalorder %s360_s18, %s607_s1 }
   0x7   :  { %p366_p2 = pnand %p364_p1, %p361_p0 }
   0x9   :  { %369 = shalt.err (!%p366_p2)
}
   0xa   :  { %s370_s23 = scalar_lea.vmem %s29_s13, 1024  ;;  %p375_p4 = scmp.lt.s32.totalorder %s29_s13, %s29_s13 }
   0xb   :  { %p371_p3 = scmp.ne.s32.totalorder %s29_s13, %s370_s23  ;;  %p376_p5 = scmp.lt.s32.totalorder %s370_s23, %s370_s23 }
   0xd   :  { %p377_p6 = por %p376_p5, %p375_p4 }
   0xf   :  { %p378_p7 = pnand %p377_p6, %p371_p3 }
  0x11   :  { %381 = shalt.err (!%p378_p7)
}
  0x12   :  { %s456_s24 = smov 128   ;;  %s457_s25 = smov 8  }
  0x13   :  { %34 = dma.hbm_to_vmem [thread:$0]  %s607_s1, 1024, %s29_s13, [#allocation6], %s456_s24, %s456_s24, %s457_s25  }
  0x14   :  { %s382_s30 = scalar_lea.hbm %s606_s0, 3072 }
  0x15   :  { %p383_p8 = scmp.ne.s32.totalorder %s606_s0, %s382_s30  ;;  %p386_p9 = scmp.lt.u32.totalorder %s382_s30, %s606_s0 }
  0x17   :  { %p388_p10 = pnand %p386_p9, %p383_p8 }
  0x19   :  { %391 = shalt.err (!%p388_p10)
}
  0x1a   :  { %s392_s8 = scalar_lea.vmem %s481_s15, 3072  ;;  %p397_p12 = scmp.lt.s32.totalorder %s481_s15, %s481_s15 }
  0x1b   :  { %p393_p11 = scmp.ne.s32.totalorder %s481_s15, %s392_s8  ;;  %p398_p13 = scmp.lt.s32.totalorder %s392_s8, %s392_s8 }
  0x1d   :  { %p399_p0 = por %p398_p13, %p397_p12 }
  0x1f   :  { %p400_p1 = pnand %p399_p0, %p393_p11 }
  0x21   :  { %403 = shalt.err (!%p400_p1)
}
  0x22   :  { %22 = dma.hbm_to_vmem [thread:$0]  %s606_s0, 3072, %s481_s15, [#allocation3], %s456_s24, %s456_s24, %s457_s25  }
  0x23   :  { %s458_s10 = smov [#allocation7]   ;;  %s404_s14 = scalar_lea.hbm %s608_s2, 128 }
  0x24   :  { %s41_s11 = sshll.u32 %s458_s10, 4  ;;  %p405_p2 = scmp.ne.s32.totalorder %s608_s2, %s404_s14  ;;  %s42_s11 = int_to_ptr.vmem [resolvable:$true] %s41_s11 }
  0x25   :  { %p408_p3 = scmp.lt.u32.totalorder %s404_s14, %s608_s2 }
  0x27   :  { %p410_p4 = pnand %p408_p3, %p405_p2 }
  0x29   :  { %413 = shalt.err (!%p410_p4)
}
  0x2a   :  { %s414_s20 = scalar_lea.vmem %s42_s11, 128  ;;  %p419_p6 = scmp.lt.s32.totalorder %s42_s11, %s42_s11 }
  0x2b   :  { %p415_p5 = scmp.ne.s32.totalorder %s42_s11, %s414_s20  ;;  %p420_p7 = scmp.lt.s32.totalorder %s414_s20, %s414_s20 }
  0x2d   :  { %p421_p8 = por %p420_p7, %p419_p6 }
  0x2f   :  { %p422_p9 = pnand %p421_p8, %p415_p5 }
  0x31   :  { %425 = shalt.err (!%p422_p9)
}
  0x32   :  { %44 = dma.hbm_to_vmem [thread:$0]  %s608_s2, 128, %s42_s11, [#allocation6]  }
  0x33   :  { %448 = dma.done.wait [#allocation3], 3072  }
  0x34   :  { %449 = vsyncadd [#allocation3], 4294964224 }
  0x35   :  { %450 = dma.done.wait [#allocation6], 1152  }
  0x36   :  { %451 = vsyncadd [#allocation6], 4294966144  ;;  %v459_v0 = vmov 0.0|0.0   ;;  %v54_v1 = vld [vmem:[#allocation2] sm:$0xff]  ;;  %v55_v2 = vld [vmem:[#allocation2 + $0x8] sm:$0xff]  ;;  %vm89_vm0 = vcmask 523264  }
  0x37   :  { %316 = vmatprep.subr.bf16.mxu1 %v459_v0  ;;  %280 = vmatprep.subr.bf16.mxu0 %v459_v0  ;;  %v526_v3 = vld [vmem:[#allocation5] sm:$0xff]  ;;  %v528_v4 = vld [vmem:[#allocation5 + $0x8] sm:$0xff]  ;;  %v281_v6 = vpack.c.bf16 %v55_v2, %v54_v1  ;;  %v56_v7 = vld [vmem:[#allocation2 + $0x10] sm:$0xff]  ;;  %s460_s2 = smov [#allocation8]   ;;  %vm259_vm1 = vcmask 1043456  }
  0x38   :  { %v162_v5 = vmul.f32 %v526_v3, %v54_v1  ;;  %v57_v8 = vld [vmem:[#allocation2 + $0x18] sm:$0xff]  ;;  %v163_v9 = vmul.f32 %v528_v4, %v55_v2  ;;  %v532_v10 = vld [vmem:[#allocation5 + $0x10] sm:$0xff]  ;;  %v58_v12 = vld [vmem:[#allocation2 + $0x20] sm:$0xff]  ;;  %s268_s21 = sshll.u32 %s460_s2, 4  ;;  %s269_s21 = int_to_ptr.vmem [resolvable:$true] %s268_s21 }
  0x39   :  { %v534_v11 = vld [vmem:[#allocation5 + $0x18] sm:$0xff]  ;;  %282 = vmatpush1.bf16.msra.mxu0 %v281_v6  ;;  %v164_v13 = vmul.f32 %v532_v10, %v56_v7  ;;  %v284_v15 = vpack.c.bf16 %v57_v8, %v56_v7  ;;  %v59_v16 = vld [vmem:[#allocation2 + $0x28] sm:$0xff]  ;;  %v538_v17 = vld [vmem:[#allocation5 + $0x20] sm:$0xff]  ;;  %s426_s22 = scalar_lea.vmem %s269_s21, 128  ;;  %p431_p11 = scmp.lt.s32.totalorder %s269_s21, %s269_s21 }
  0x3a   :  { %v165_v14 = vmul.f32 %v534_v11, %v57_v8  ;;  %v540_v18 = vld [vmem:[#allocation5 + $0x28] sm:$0xff]  ;;  %v317_v19 = vpack.c.bf16 %v163_v9, %v162_v5  ;;  %283 = vmatprep.subr.bf16.mxu0 %v459_v0  ;;  %v166_v21 = vmul.f32 %v538_v17, %v58_v12  ;;  %v60_v23 = vld [vmem:[#allocation2 + $0x30] sm:$0xff]  ;;  %v287_v24 = vpack.c.bf16 %v59_v16, %v58_v12  ;;  %v61_v25 = vld [vmem:[#allocation2 + $0x38] sm:$0xff]  ;;  %p427_p10 = scmp.ne.s32.totalorder %s269_s21, %s426_s22  ;;  %p432_p12 = scmp.lt.s32.totalorder %s426_s22, %s426_s22 }
  0x3b   :  { %v167_v22 = vmul.f32 %v540_v18, %v59_v16  ;;  %v546_v26 = vld [vmem:[#allocation5 + $0x30] sm:$0xff]  ;;  %v548_v27 = vld [vmem:[#allocation5 + $0x38] sm:$0xff]  ;;  %v290_v31 = vpack.c.bf16 %v61_v25, %v60_v23  ;;  %v62_v32 = vld [vmem:[#allocation2 + $0x40] sm:$0xff] }
  0x3c   :  { %318 = vmatpush1.bf16.msra.mxu1 %v317_v19  ;;  %v320_v20 = vpack.c.bf16 %v165_v14, %v164_v13  ;;  %v168_v29 = vmul.f32 %v546_v26, %v60_v23  ;;  %v169_v30 = vmul.f32 %v548_v27, %v61_v25  ;;  %v63_v33 = vld [vmem:[#allocation2 + $0x48] sm:$0xff]  ;;  %v554_v34 = vld [vmem:[#allocation7] sm:$0xff]  ;;  %v170_v36 = vmul.f32 %v526_v3, %v62_v32  ;;  %v64_v40 = vld [vmem:[#allocation2 + $0x50] sm:$0xff]  ;;  %p433_p13 = por %p432_p12, %p431_p11 }
  0x3d   :  { %319 = vmatprep.subr.bf16.mxu1 %v459_v0  ;;  %285 = vmatpush1.bf16.msra.mxu0 %v284_v15  ;;  %v323_v28 = vpack.c.bf16 %v167_v22, %v166_v21  ;;  %v171_v37 = vmul.f32 %v528_v4, %v63_v33  ;;  %v88_v38 = vcombine.high %v554_v34, %v554_v34  ;;  %v65_v41 = vld [vmem:[#allocation2 + $0x58] sm:$0xff]  ;;  %v66_v46 = vld [vmem:[#allocation2 + $0x60] sm:$0xff]  ;;  %v67_v47 = vld [vmem:[#allocation2 + $0x68] sm:$0xff] }
  0x3e   :  { %286 = vmatprep.subr.bf16.mxu0 %v459_v0  ;;  %v326_v35 = vpack.c.bf16 %v169_v30, %v168_v29  ;;  %v293_v39 = vpack.c.bf16 %v63_v33, %v62_v32  ;;  %v172_v43 = vmul.f32 %v532_v10, %v64_v40  ;;  %v173_v44 = vmul.f32 %v534_v11, %v65_v41  ;;  %v68_v52 = vld [vmem:[#allocation2 + $0x70] sm:$0xff]  ;;  %v69_v53 = vld [vmem:[#allocation2 + $0x78] sm:$0xff]  ;;  %v70_v58 = vld [vmem:[#allocation2 + $0x80] sm:$0xff]  ;;  %p434_p0 = pnand %p433_p13, %p427_p10 }
  0x3f   :  { %279 = vmatprep.mubr.msk.f32.mxu1 %vm89_vm0, %v88_v38  ;;  %278 = vmatprep.mubr.msk.f32.mxu0 %vm89_vm0, %v88_v38  ;;  %v329_v42 = vpack.c.bf16 %v171_v37, %v170_v36  ;;  %v296_v45 = vpack.c.bf16 %v65_v41, %v64_v40  ;;  %v174_v49 = vmul.f32 %v538_v17, %v66_v46  ;;  %v71_v59 = vld [vmem:[#allocation2 + $0x88] sm:$0xff]  ;;  %v72_v1 = vld [vmem:[#allocation2 + $0x90] sm:$0xff]  ;;  %v73_v2 = vld [vmem:[#allocation2 + $0x98] sm:$0xff] }
  0x40   :  { %321 = vmatpush1.bf16.msra.mxu1 %v320_v20  ;;  %v332_v48 = vpack.c.bf16 %v173_v44, %v172_v43  ;;  %v175_v50 = vmul.f32 %v540_v18, %v67_v47  ;;  %v299_v51 = vpack.c.bf16 %v67_v47, %v66_v46  ;;  %v176_v55 = vmul.f32 %v546_v26, %v68_v52  ;;  %v74_v8 = vld [vmem:[#allocation2 + $0xa0] sm:$0xff]  ;;  %v76_v14 = vld [vmem:[#allocation2 + $0xb0] sm:$0xff] }
  0x41   :  { %322 = vmatprep.subr.bf16.mxu1 %v459_v0  ;;  %288 = vmatpush1.bf16.msra.mxu0 %v287_v24  ;;  %v177_v56 = vmul.f32 %v548_v27, %v69_v53  ;;  %v302_v57 = vpack.c.bf16 %v69_v53, %v68_v52  ;;  %v178_v61 = vmul.f32 %v526_v3, %v70_v58 }
  0x42   :  { %289 = vmatprep.subr.bf16.mxu0 %v459_v0  ;;  %v335_v54 = vpack.c.bf16 %v175_v50, %v174_v49  ;;  %v179_v62 = vmul.f32 %v528_v4, %v71_v59  ;;  %v305_v63 = vpack.c.bf16 %v71_v59, %v70_v58  ;;  %v180_v6 = vmul.f32 %v532_v10, %v72_v1  ;;  %v75_v4 = vld [vmem:[#allocation2 + $0xa8] sm:$0xff] }
  0x43   :  { %v338_v60 = vpack.c.bf16 %v177_v56, %v176_v55  ;;  %v181_v7 = vmul.f32 %v534_v11, %v73_v2  ;;  %v308_v3 = vpack.c.bf16 %v73_v2, %v72_v1  ;;  %v182_v12 = vmul.f32 %v538_v17, %v74_v8  ;;  %v77_v11 = vld [vmem:[#allocation2 + $0xb8] sm:$0xff] }
  0x44   :  { %324 = vmatpush1.bf16.msra.mxu1 %v323_v28  ;;  %v341_v5 = vpack.c.bf16 %v179_v62, %v178_v61  ;;  %v183_v13 = vmul.f32 %v540_v18, %v75_v4  ;;  %v311_v10 = vpack.c.bf16 %v75_v4, %v74_v8  ;;  %v184_v16 = vmul.f32 %v546_v26, %v76_v14 }
  0x45   :  { %325 = vmatprep.subr.bf16.mxu1 %v459_v0  ;;  %291 = vmatpush1.bf16.msra.mxu0 %v290_v31  ;;  %v344_v9 = vpack.c.bf16 %v181_v7, %v180_v6  ;;  %v185_v19 = vmul.f32 %v548_v27, %v77_v11  ;;  %v314_v17 = vpack.c.bf16 %v77_v11, %v76_v14 }
  0x46   :  { %292 = vmatprep.subr.bf16.mxu0 %v459_v0  ;;  %v347_v15 = vpack.c.bf16 %v183_v13, %v182_v12 }
  0x47   :  { %v350_v18 = vpack.c.bf16 %v185_v19, %v184_v16 }
  0x48   :  { %327 = vmatpush1.bf16.msra.mxu1 %v326_v35 }
  0x49   :  { %328 = vmatprep.subr.bf16.mxu1 %v459_v0  ;;  %294 = vmatpush1.bf16.msra.mxu0 %v293_v39 }
  0x4a   :  { %295 = vmatprep.subr.bf16.mxu0 %v459_v0 }
  0x4c   :  { %330 = vmatpush1.bf16.msra.mxu1 %v329_v42 }
  0x4d   :  { %331 = vmatprep.subr.bf16.mxu1 %v459_v0  ;;  %297 = vmatpush1.bf16.msra.mxu0 %v296_v45 }
  0x4e   :  { %298 = vmatprep.subr.bf16.mxu0 %v459_v0 }
  0x50   :  { %333 = vmatpush1.bf16.msra.mxu1 %v332_v48 }
  0x51   :  { %334 = vmatprep.subr.bf16.mxu1 %v459_v0  ;;  %300 = vmatpush1.bf16.msra.mxu0 %v299_v51 }
  0x52   :  { %301 = vmatprep.subr.bf16.mxu0 %v459_v0 }
  0x54   :  { %336 = vmatpush1.bf16.msra.mxu1 %v335_v54 }
  0x55   :  { %337 = vmatprep.subr.bf16.mxu1 %v459_v0  ;;  %303 = vmatpush1.bf16.msra.mxu0 %v302_v57 }
  0x56   :  { %304 = vmatprep.subr.bf16.mxu0 %v459_v0 }
  0x58   :  { %339 = vmatpush1.bf16.msra.mxu1 %v338_v60 }
  0x59   :  { %340 = vmatprep.subr.bf16.mxu1 %v459_v0  ;;  %306 = vmatpush1.bf16.msra.mxu0 %v305_v63 }
  0x5a   :  { %307 = vmatprep.subr.bf16.mxu0 %v459_v0 }
  0x5c   :  { %342 = vmatpush1.bf16.msra.mxu1 %v341_v5 }
  0x5d   :  { %343 = vmatprep.subr.bf16.mxu1 %v459_v0  ;;  %309 = vmatpush1.bf16.msra.mxu0 %v308_v3 }
  0x5e   :  { %310 = vmatprep.subr.bf16.mxu0 %v459_v0 }
  0x60   :  { %345 = vmatpush1.bf16.msra.mxu1 %v344_v9 }
  0x61   :  { %346 = vmatprep.subr.bf16.mxu1 %v459_v0  ;;  %312 = vmatpush1.bf16.msra.mxu0 %v311_v10 }
  0x62   :  { %313 = vmatprep.subr.bf16.mxu0 %v459_v0 }
  0x64   :  { %348 = vmatpush1.bf16.msra.mxu1 %v347_v15 }
  0x65   :  { %349 = vmatprep.subr.bf16.mxu1 %v459_v0  ;;  %315 = vmatpush1.bf16.msra.mxu0 %v314_v17 }
  0x68   :  { %351 = vmatpush1.bf16.msra.mxu1 %v350_v18  ;;  %157 = vmatmul.mubr.f32.vlgmr.msra.gmra.mrb[0].mxu0 %v554_v34 }
  0x6b   :  { %251 = vmatmul.mubr.f32.vlgmr.msra.gmra.mrb[0].mxu1 %v554_v34 }
 0x13b   :  { %v158_v20 = vpop.f32.mrb[0].mxu0 }
 0x13c   :  { %v160_v21 = vpop.f32.mrb[1].mxu0 }
 0x13e   :  { %v252_v22 = vpop.f32.mrb[0].mxu1 }
 0x13f   :  { %v257_v23 = vrot.slane %v252_v22, 4  ;;  %v254_v24 = vpop.f32.mrb[1].mxu1 }
 0x141   :  { %v260_v25 = vsel %vm259_vm1, %v158_v20, %v257_v23 }
 0x142   :  { %261 = vst [vmem:[#allocation8] sm:$0xff] %v260_v25 }
 0x143   :  { %437 = shalt.err (!%p434_p0)
}
 0x144   :  { %s438_s25 = scalar_lea.hbm %s609_s3, 128 }
 0x145   :  { %p439_p1 = scmp.ne.s32.totalorder %s609_s3, %s438_s25  ;;  %p442_p2 = scmp.lt.u32.totalorder %s438_s25, %s609_s3 }
 0x147   :  { %p444_p3 = pnand %p442_p2, %p439_p1 }
 0x149   :  { %447 = shalt.err (!%p444_p3)
}
 0x14a   :  { %271 = dma.vmem_to_hbm [thread:$0]  %s269_s21, 128, %s609_s3, [#allocation4]  }
 0x14b   :  { %452 = dma.done.wait [#allocation4], 128  }
 0x14c   :  { %453 = vsyncadd [#allocation4], 4294967168 }
 0x14d   :  { %275 = vsyncpa [#allocation3], 1 }
 0x14e   :  { %276 = vsyncpa [#allocation6], 1 }
 0x14f   :  { %277 = vsyncpa [#allocation4], 1 }

</bundles_post_ra>
